<compile_context>
chip_gen: v7x
topology: tpu7x:2x2x1
jax: 0.10.0
libtpu: 0.0.40
codegen_flags: <defaults>
</compile_context>

<pallas_src>
import jax
import jax.numpy as jnp
from jax.experimental import pallas as pl
from jax.experimental.pallas import tpu as pltpu


def _sigmoid(z):
    # Explicit exp-based form guaranteed to lower on Mosaic (EUP exp + divide).
    return 1.0 / (1.0 + jnp.exp(-z))


def _lstm_cell_kernel(xh_ref, c_ref, w_ref, b_ref, ht_ref, ct_ref):
    """One LSTM cell step for a (tile_b, ...) batch tile.

    gates = [x | h] @ W + b, column order [i | f | g | o], each of width H.
    """
    H = c_ref.shape[-1]

    gates = (
        jnp.dot(xh_ref[...], w_ref[...], preferred_element_type=jnp.float32)
        + b_ref[...]
    )

    i_t = _sigmoid(gates[:, 0 * H:1 * H])
    f_t = _sigmoid(gates[:, 1 * H:2 * H])
    g_t = jnp.tanh(gates[:, 2 * H:3 * H])
    o_t = _sigmoid(gates[:, 3 * H:4 * H])

    c_t = f_t * c_ref[...].astype(jnp.float32) + i_t * g_t
    h_t = o_t * jnp.tanh(c_t)

    ct_ref[...] = c_t.astype(ct_ref.dtype)
    ht_ref[...] = h_t.astype(ht_ref.dtype)


def _round_up(n, m):
    return ((n + m - 1) // m) * m


def lstm_cell(x, h_prev, c_prev, w, b, *, tile_b=256):
    """Batched LSTM cell step via one Pallas call.

    x:      (B, I)
    h_prev: (B, H)
    c_prev: (B, H)
    w:      (I+H, 4H)  packed weights, rows = [input rows | hidden rows],
                       gate column order i, f, g, o
    b:      (4H,)      packed biases (input-bias + hidden-bias per gate)
    Returns (h_t, c_t), each (B, H).
    """
    B, I = x.shape
    H = h_prev.shape[1]
    dtype = x.dtype

    # Fuse the two gate matmuls into a single MXU dot via row concatenation.
    xh = jnp.concatenate([x, h_prev], axis=1)          # (B, I+H)

    # Batch tile: multiple of 8 sublanes, capped by the requested tile size.
    tb = min(tile_b, _round_up(B, 8))
    Bp = _round_up(B, tb)
    if Bp != B:
        pad = ((0, Bp - B), (0, 0))
        xh = jnp.pad(xh, pad)
        c_prev = jnp.pad(c_prev, pad)

    grid = (Bp // tb,)

    def row_spec(d):
        # Pipelined per-grid-step row tile.
        return pl.BlockSpec((tb, d), lambda i: (i, 0))

    def resident(shape):
        # Same block every grid step -> operand stays resident in VMEM.
        return pl.BlockSpec(shape, lambda i: (0, 0))

    h_t, c_t = pl.pallas_call(
        _lstm_cell_kernel,
        grid=grid,
        in_specs=[
            row_spec(I + H),            # [x | h] tile
            row_spec(H),                # c_prev tile
            resident((I + H, 4 * H)),   # packed weights (resident)
            resident((1, 4 * H)),       # packed bias (resident)
        ],
        out_specs=(row_spec(H), row_spec(H)),
        out_shape=(
            jax.ShapeDtypeStruct((Bp, H), dtype),
            jax.ShapeDtypeStruct((Bp, H), dtype),
        ),
        compiler_params=pltpu.CompilerParams(
            dimension_semantics=("parallel",),
        ),
    )(xh, c_prev, w, b.reshape(1, -1))

    return h_t[:B], c_t[:B]


def pack_lstm_params(p):
    """Pack the 8 weight matrices / 8 biases into fused operands (done once).

    Returns:
      w: (I+H, 4H) so that [x | h] @ w == concat_g(W_ig @ x + W_hg @ h).
      b: (4H,)     summed per-gate biases.
    """
    w_x = jnp.concatenate([p["W_ii"], p["W_if"], p["W_ig"], p["W_io"]], axis=0).T
    w_h = jnp.concatenate([p["W_hi"], p["W_hf"], p["W_hg"], p["W_ho"]], axis=0).T
    w = jnp.concatenate([w_x, w_h], axis=0)            # (I+H, 4H)
    b = jnp.concatenate([
        p["b_ii"] + p["b_hi"],
        p["b_if"] + p["b_hf"],
        p["b_ig"] + p["b_hg"],
        p["b_io"] + p["b_ho"],
    ])
    return w, b


def lstm_forward(params, x, hidden=None):
    """Mirror of the PyTorch module's forward: x is a 1-D (input_size,) vector.

    Returns (h_t, (h_t, c_t)) with h_t, c_t of shape (hidden_size,).
    """
    H = params["W_hi"].shape[0]
    if hidden is None:
        h_prev = jnp.zeros((H,), x.dtype)
        c_prev = jnp.zeros((H,), x.dtype)
    else:
        h_prev, c_prev = hidden

    w, b = pack_lstm_params(params)
    h_t, c_t = lstm_cell(x[None, :], h_prev[None, :], c_prev[None, :], w, b)
    h_t = h_t[0]
    c_t = c_t[0]
    return h_t, (h_t, c_t)


def _reference_cell(params, x, h_prev, c_prev):
    """Pure-JAX transcription of the PyTorch forward (source of truth)."""
    p = params
    sigm = jax.nn.sigmoid
    i_t = sigm(p["W_ii"] @ x + p["b_ii"] + p["W_hi"] @ h_prev + p["b_hi"])
    f_t = sigm(p["W_if"] @ x + p["b_if"] + p["W_hf"] @ h_prev + p["b_hf"])
    g_t = jnp.tanh(p["W_ig"] @ x + p["b_ig"] + p["W_hg"] @ h_prev + p["b_hg"])
    o_t = sigm(p["W_io"] @ x + p["b_io"] + p["W_ho"] @ h_prev + p["b_ho"])
    c_t = f_t * c_prev + i_t * g_t
    h_t = o_t * jnp.tanh(c_t)
    return h_t, c_t


if __name__ == "__main__":
    input_size = 16
    hidden_size = 32   # 4*H = 128 -> lane-dense packed gate matmul

    key = jax.random.PRNGKey(0)
    keys = jax.random.split(key, 12)

    names_i = ["W_ii", "W_if", "W_ig", "W_io"]
    names_h = ["W_hi", "W_hf", "W_hg", "W_ho"]
    params = {}
    for k, n in zip(keys[:4], names_i):
        params[n] = jax.random.normal(k, (hidden_size, input_size), jnp.float32)
    for k, n in zip(keys[4:8], names_h):
        params[n] = jax.random.normal(k, (hidden_size, hidden_size), jnp.float32)
    for n in ["b_ii", "b_if", "b_ig", "b_io", "b_hi", "b_hf", "b_hg", "b_ho"]:
        params[n] = jnp.zeros((hidden_size,), jnp.float32)   # matches torch.zeros bias

    # ---- exact module semantics: single vector, hidden=None ----
    x = jax.random.normal(keys[8], (input_size,), jnp.float32)
    h_t, (h_same, c_t) = lstm_forward(params, x)
    h_t = jax.block_until_ready(h_t)
    h_ref, c_ref = _reference_cell(
        params, x, jnp.zeros((hidden_size,), jnp.float32),
        jnp.zeros((hidden_size,), jnp.float32))
    assert h_t.shape == (hidden_size,) and c_t.shape == (hidden_size,)
    assert jnp.allclose(h_t, h_ref, atol=1e-4, rtol=1e-4), "h mismatch (hidden=None)"
    assert jnp.allclose(c_t, c_ref, atol=1e-4, rtol=1e-4), "c mismatch (hidden=None)"
    assert jnp.allclose(h_t, h_same), "tuple h must equal returned h"

    # ---- exact module semantics: explicit (h, c) hidden ----
    h0 = jax.random.normal(keys[9], (hidden_size,), jnp.float32) * 0.1
    c0 = jax.random.normal(keys[10], (hidden_size,), jnp.float32) * 0.1
    h_t2, (_, c_t2) = lstm_forward(params, x, (h0, c0))
    h_t2 = jax.block_until_ready(h_t2)
    h_ref2, c_ref2 = _reference_cell(params, x, h0, c0)
    assert jnp.allclose(h_t2, h_ref2, atol=1e-4, rtol=1e-4), "h mismatch (hidden given)"
    assert jnp.allclose(c_t2, c_ref2, atol=1e-4, rtol=1e-4), "c mismatch (hidden given)"

    # ---- batched cell step: exercises the grid / pipelined / parallel path ----
    B = 64
    xb = jax.random.normal(jax.random.PRNGKey(1), (B, input_size), jnp.float32)
    hb = jax.random.normal(jax.random.PRNGKey(2), (B, hidden_size), jnp.float32) * 0.1
    cb = jax.random.normal(jax.random.PRNGKey(3), (B, hidden_size), jnp.float32) * 0.1
    w, b = pack_lstm_params(params)
    hb_t, cb_t = lstm_cell(xb, hb, cb, w, b, tile_b=16)   # grid of 4 steps
    hb_t = jax.block_until_ready(hb_t)
    hb_ref, cb_ref = jax.vmap(
        lambda xx, hh, cc: _reference_cell(params, xx, hh, cc))(xb, hb, cb)
    assert jnp.allclose(hb_t, hb_ref, atol=1e-4, rtol=1e-4), "batched h mismatch"
    assert jnp.allclose(cb_t, cb_ref, atol=1e-4, rtol=1e-4), "batched c mismatch"

    print("KERNEL_OK")
</pallas_src>

<mosaic_0001>
module attributes {stable_mosaic.version = 11 : i64} {
  func.func @_lstm_cell_kernel(%arg0: i32, %arg1: memref<8x48xf32, #tpu.memory_space<vmem>>, %arg2: memref<8x32xf32, #tpu.memory_space<vmem>>, %arg3: memref<48x128xf32, #tpu.memory_space<vmem>>, %arg4: memref<1x128xf32, #tpu.memory_space<vmem>>, %arg5: memref<8x32xf32, #tpu.memory_space<vmem>>, %arg6: memref<8x32xf32, #tpu.memory_space<vmem>>) attributes {dimension_semantics = [#tpu.dimension_semantics<parallel>], iteration_bounds = array<i64: 1>, scalar_prefetch = 0 : i64, scratch_operands = 0 : i64, tpu.core_type = #tpu.core_type<tc>, window_params = [{transform_indices = @transform_0, window_bounds = array<i64: 8, 48>}, {transform_indices = @transform_1, window_bounds = array<i64: 8, 32>}, {pipeline_mode = #tpu.pipeline_mode<synchronous>, transform_indices = @transform_2, window_bounds = array<i64: 48, 128>}, {pipeline_mode = #tpu.pipeline_mode<synchronous>, transform_indices = @transform_3, window_bounds = array<i64: 1, 128>}, {transform_indices = @transform_4, window_bounds = array<i64: 8, 32>}, {transform_indices = @transform_5, window_bounds = array<i64: 8, 32>}]} {
    %c0 = arith.constant 0 : index
    %c0_0 = arith.constant 0 : index
    %0 = vector.load %arg1[%c0, %c0_0] : memref<8x48xf32, #tpu.memory_space<vmem>>, vector<8x48xf32>
    %c0_1 = arith.constant 0 : index
    %c0_2 = arith.constant 0 : index
    %1 = vector.load %arg3[%c0_1, %c0_2] : memref<48x128xf32, #tpu.memory_space<vmem>>, vector<48x128xf32>
    %cst = arith.constant dense<0.000000e+00> : vector<8x128xf32>
    %2 = tpu.matmul %0, %1, %cst {dimension_numbers = #tpu.dot_dimension_numbers<[1], [0], [0], [1], [0, 0, 1, 1], [], []>} : vector<8x48xf32>, vector<48x128xf32>, vector<8x128xf32> -> vector<8x128xf32>
    %c0_3 = arith.constant 0 : index
    %c0_4 = arith.constant 0 : index
    %3 = vector.load %arg4[%c0_3, %c0_4] : memref<1x128xf32, #tpu.memory_space<vmem>>, vector<1x128xf32>
    %4 = vector.broadcast %3 : vector<1x128xf32> to vector<8x128xf32>
    %5 = arith.addf %2, %4 : vector<8x128xf32>
    %6 = vector.extract_strided_slice %5 {offsets = [0, 0], sizes = [8, 32], strides = [1, 1]} : vector<8x128xf32> to vector<8x32xf32>
    %cst_5 = arith.constant 0.000000e+00 : f32
    %7 = vector.broadcast %cst_5 : f32 to vector<8x32xf32>
    %8 = arith.subf %7, %6 : vector<8x32xf32>
    %9 = math.exp %8 : vector<8x32xf32>
    %cst_6 = arith.constant 1.000000e+00 : f32
    %10 = vector.broadcast %cst_6 : f32 to vector<8x32xf32>
    %11 = arith.addf %10, %9 : vector<8x32xf32>
    %cst_7 = arith.constant 1.000000e+00 : f32
    %12 = vector.broadcast %cst_7 : f32 to vector<8x32xf32>
    %13 = arith.divf %12, %11 : vector<8x32xf32>
    %14 = vector.extract_strided_slice %5 {offsets = [0, 32], sizes = [8, 32], strides = [1, 1]} : vector<8x128xf32> to vector<8x32xf32>
    %cst_8 = arith.constant 0.000000e+00 : f32
    %15 = vector.broadcast %cst_8 : f32 to vector<8x32xf32>
    %16 = arith.subf %15, %14 : vector<8x32xf32>
    %17 = math.exp %16 : vector<8x32xf32>
    %cst_9 = arith.constant 1.000000e+00 : f32
    %18 = vector.broadcast %cst_9 : f32 to vector<8x32xf32>
    %19 = arith.addf %18, %17 : vector<8x32xf32>
    %cst_10 = arith.constant 1.000000e+00 : f32
    %20 = vector.broadcast %cst_10 : f32 to vector<8x32xf32>
    %21 = arith.divf %20, %19 : vector<8x32xf32>
    %22 = vector.extract_strided_slice %5 {offsets = [0, 64], sizes = [8, 32], strides = [1, 1]} : vector<8x128xf32> to vector<8x32xf32>
    %23 = math.tanh %22 : vector<8x32xf32>
    %24 = vector.extract_strided_slice %5 {offsets = [0, 96], sizes = [8, 32], strides = [1, 1]} : vector<8x128xf32> to vector<8x32xf32>
    %cst_11 = arith.constant 0.000000e+00 : f32
    %25 = vector.broadcast %cst_11 : f32 to vector<8x32xf32>
    %26 = arith.subf %25, %24 : vector<8x32xf32>
    %27 = math.exp %26 : vector<8x32xf32>
    %cst_12 = arith.constant 1.000000e+00 : f32
    %28 = vector.broadcast %cst_12 : f32 to vector<8x32xf32>
    %29 = arith.addf %28, %27 : vector<8x32xf32>
    %cst_13 = arith.constant 1.000000e+00 : f32
    %30 = vector.broadcast %cst_13 : f32 to vector<8x32xf32>
    %31 = arith.divf %30, %29 : vector<8x32xf32>
    %c0_14 = arith.constant 0 : index
    %c0_15 = arith.constant 0 : index
    %32 = vector.load %arg2[%c0_14, %c0_15] : memref<8x32xf32, #tpu.memory_space<vmem>>, vector<8x32xf32>
    %33 = arith.mulf %21, %32 : vector<8x32xf32>
    %34 = arith.mulf %13, %23 : vector<8x32xf32>
    %35 = arith.addf %33, %34 : vector<8x32xf32>
    %36 = math.tanh %35 : vector<8x32xf32>
    %37 = arith.mulf %31, %36 : vector<8x32xf32>
    %c0_16 = arith.constant 0 : index
    %c0_17 = arith.constant 0 : index
    %38 = vector.load %arg6[%c0_16, %c0_17] : memref<8x32xf32, #tpu.memory_space<vmem>>, vector<8x32xf32>
    tpu.vector_store %arg6[%c0_16, %c0_17], %35 {strides = array<i32>} : memref<8x32xf32, #tpu.memory_space<vmem>>, vector<8x32xf32>,
    %c0_18 = arith.constant 0 : index
    %c0_19 = arith.constant 0 : index
    %39 = vector.load %arg5[%c0_18, %c0_19] : memref<8x32xf32, #tpu.memory_space<vmem>>, vector<8x32xf32>
    tpu.vector_store %arg5[%c0_18, %c0_19], %37 {strides = array<i32>} : memref<8x32xf32, #tpu.memory_space<vmem>>, vector<8x32xf32>,
    return
  }
  func.func @transform_0(%arg0: i32) -> (i32, i32) {
    %c0_i32 = arith.constant 0 : i32
    %c0_i32_0 = arith.constant 0 : i32
    return %arg0, %c0_i32 : i32, i32
  }
  func.func @transform_1(%arg0: i32) -> (i32, i32) {
    %c0_i32 = arith.constant 0 : i32
    %c0_i32_0 = arith.constant 0 : i32
    return %arg0, %c0_i32 : i32, i32
  }
  func.func @transform_2(%arg0: i32) -> (i32, i32) {
    %c0_i32 = arith.constant 0 : i32
    %c0_i32_0 = arith.constant 0 : i32
    %c0_i32_1 = arith.constant 0 : i32
    return %c0_i32, %c0_i32_0 : i32, i32
  }
  func.func @transform_3(%arg0: i32) -> (i32, i32) {
    %c0_i32 = arith.constant 0 : i32
    %c0_i32_0 = arith.constant 0 : i32
    %c0_i32_1 = arith.constant 0 : i32
    return %c0_i32, %c0_i32_0 : i32, i32
  }
  func.func @transform_4(%arg0: i32) -> (i32, i32) {
    %c0_i32 = arith.constant 0 : i32
    %c0_i32_0 = arith.constant 0 : i32
    return %arg0, %c0_i32 : i32, i32
  }
  func.func @transform_5(%arg0: i32) -> (i32, i32) {
    %c0_i32 = arith.constant 0 : i32
    %c0_i32_0 = arith.constant 0 : i32
    return %arg0, %c0_i32 : i32, i32
  }
}

</mosaic_0001>

<bundles_post_ra>
// kernel: tpu_custom_call.1
= control target key start
LH: loop header
LB: loop body
LE: loop exit
PB: predicated region body
PF: predicated region fallthrough
CT: control target
= control target key end

     0   :  { %11 = vsyncpa [#allocation3], 0  ;;  %s499_s0 = inlined_call_operand.hbm [shape: f32[8,48], index: 0, kind: input, shape index: {}]   ;;  %s500_s1 = inlined_call_operand.hbm [shape: f32[8,32], index: 1, kind: input, shape index: {}]   ;;  %s501_s2 = inlined_call_operand.hbm [shape: f32[48,128], index: 2, kind: input, shape index: {}]   ;;  %s502_s3 = inlined_call_operand.vmem [shape: f32[1,128], index: 3, kind: input, shape index: {}]   ;;  %s503_s4 = inlined_call_operand.hbm [shape: f32[8,32], index: 4, kind: output, shape index: {0}]   ;;  %s504_s5 = inlined_call_operand.hbm [shape: f32[8,32], index: 5, kind: output, shape index: {1}]  }
   0x1   :  { %12 = vsyncpa [#allocation6], 0 }
   0x2   :  { %13 = vsyncpa [#allocation4], 0 }
   0x3   :  { %14 = vsyncpa [#allocation10], 0  ;;  %s388_s18 = smov [#allocation5]   ;;  %s389_s20 = smov [#allocation2]  }
   0x4   :  { %s31_s19 = sshll.u32 %s388_s18, 4  ;;  %s21_s21 = sshll.u32 %s389_s20, 4  ;;  %s32_s19 = int_to_ptr.vmem [resolvable:$true] %s31_s19  ;;  %s22_s21 = int_to_ptr.vmem [resolvable:$true] %s21_s21 }
   0x5   :  { %s270_s24 = scalar_lea.hbm %s500_s1, 128 }
   0x6   :  { %p271_p0 = scmp.ne.s32.totalorder %s500_s1, %s270_s24  ;;  %p274_p1 = scmp.lt.u32.totalorder %s270_s24, %s500_s1 }
   0x8   :  { %p276_p2 = pnand %p274_p1, %p271_p0 }
   0xa   :  { %279 = shalt.err (!%p276_p2)
}
   0xb   :  { %s280_s29 = scalar_lea.vmem %s32_s19, 128  ;;  %p285_p4 = scmp.lt.s32.totalorder %s32_s19, %s32_s19 }
   0xc   :  { %p281_p3 = scmp.ne.s32.totalorder %s32_s19, %s280_s29  ;;  %p286_p5 = scmp.lt.s32.totalorder %s280_s29, %s280_s29 }
   0xe   :  { %p287_p6 = por %p286_p5, %p285_p4 }
  0x10   :  { %p288_p7 = pnand %p287_p6, %p281_p3 }
  0x12   :  { %291 = shalt.err (!%p288_p7)
}
  0x13   :  { %34 = dma.hbm_to_vmem [thread:$0]  %s500_s1, 128, %s32_s19, [#allocation6]  }
  0x14   :  { %s292_s9 = scalar_lea.hbm %s499_s0, 128 }
  0x15   :  { %p293_p8 = scmp.ne.s32.totalorder %s499_s0, %s292_s9  ;;  %p296_p9 = scmp.lt.u32.totalorder %s292_s9, %s499_s0 }
  0x17   :  { %p298_p10 = pnand %p296_p9, %p293_p8 }
  0x19   :  { %301 = shalt.err (!%p298_p10)
}
  0x1a   :  { %s302_s14 = scalar_lea.vmem %s22_s21, 128  ;;  %p307_p12 = scmp.lt.s32.totalorder %s22_s21, %s22_s21 }
  0x1b   :  { %p303_p11 = scmp.ne.s32.totalorder %s22_s21, %s302_s14  ;;  %p308_p13 = scmp.lt.s32.totalorder %s302_s14, %s302_s14 }
  0x1d   :  { %p309_p0 = por %p308_p13, %p307_p12 }
  0x1f   :  { %p310_p1 = pnand %p309_p0, %p303_p11 }
  0x21   :  { %313 = shalt.err (!%p310_p1)
}
  0x22   :  { %24 = dma.hbm_to_vmem [thread:$0]  %s499_s0, 128, %s22_s21, [#allocation3]  }
  0x23   :  { %s390_s16 = smov [#allocation7]   ;;  %s314_s20 = scalar_lea.hbm %s501_s2, 768 }
  0x24   :  { %s40_s17 = sshll.u32 %s390_s16, 4  ;;  %p315_p2 = scmp.ne.s32.totalorder %s501_s2, %s314_s20  ;;  %s41_s17 = int_to_ptr.vmem [resolvable:$true] %s40_s17 }
  0x25   :  { %p318_p3 = scmp.lt.u32.totalorder %s314_s20, %s501_s2 }
  0x27   :  { %p320_p4 = pnand %p318_p3, %p315_p2 }
  0x29   :  { %323 = shalt.err (!%p320_p4)
}
  0x2a   :  { %s324_s26 = scalar_lea.vmem %s41_s17, 768  ;;  %p329_p6 = scmp.lt.s32.totalorder %s41_s17, %s41_s17 }
  0x2b   :  { %p325_p5 = scmp.ne.s32.totalorder %s41_s17, %s324_s26  ;;  %p330_p7 = scmp.lt.s32.totalorder %s324_s26, %s324_s26 }
  0x2d   :  { %p331_p8 = por %p330_p7, %p329_p6 }
  0x2f   :  { %p332_p9 = pnand %p331_p8, %p325_p5 }
  0x31   :  { %335 = shalt.err (!%p332_p9)
}
  0x32   :  { %s391_s0 = smov 128   ;;  %s392_s21 = smov 8  }
  0x33   :  { %46 = dma.hbm_to_vmem [thread:$0]  %s501_s2, 768, %s41_s17, [#allocation6], %s391_s0, %s391_s0, %s392_s21  }
  0x34   :  { %380 = dma.done.wait [#allocation3], 128  }
  0x35   :  { %381 = vsyncadd [#allocation3], 4294967168 }
  0x36   :  { %382 = dma.done.wait [#allocation6], 896  }
  0x37   :  { %383 = vsyncadd [#allocation6], 4294966400  ;;  %v393_v0 = vmov 0.0|0.0   ;;  %vm394_vm0 = vmmov 0   ;;  %v395_v1 = vmov 0.0   ;;  %v59_v2 = vld [vmem:[#allocation7] sm:$0xff] }
  0x38   :  { %240 = vmatprep.subr.bf16.mxu0 %v393_v0  ;;  %237 = vmatprep.mubr.msk.f32.mxu0 %vm394_vm0, %v395_v1  ;;  %v60_v3 = vld [vmem:[#allocation7 + $0x8] sm:$0xff]  ;;  %v61_v4 = vld [vmem:[#allocation7 + $0x10] sm:$0xff]  ;;  %v62_v6 = vld [vmem:[#allocation7 + $0x18] sm:$0xff]  ;;  %vm72_vm1 = vcmask 392192   ;;  %s396_s30 = smov 64   ;;  %s397_s6 = smov 32  }
  0x39   :  { %v241_v5 = vpack.c.bf16 %v60_v3, %v59_v2  ;;  %v244_v7 = vpack.c.bf16 %v62_v6, %v61_v4  ;;  %v63_v8 = vld [vmem:[#allocation7 + $0x20] sm:$0xff]  ;;  %v64_v9 = vld [vmem:[#allocation7 + $0x28] sm:$0xff]  ;;  %v58_v11 = vld [vmem:[#allocation2] sm:$0xff]  ;;  %vm179_vm2 = vcmask 261120   ;;  %s399_s7 = smov [#allocation9]  }
  0x3a   :  { %v247_v10 = vpack.c.bf16 %v64_v9, %v63_v8  ;;  %v216_v12 = vld [vmem:[%s502_s3] ss:$0 sm:$0xff]  ;;  %v153_v17 = vld [vmem:[#allocation5] sm:$0xff]  ;;  %s398_s3 = smov 96   ;;  %s202_s8 = sshll.u32 %s399_s7, 4  ;;  %s203_s8 = int_to_ptr.vmem [resolvable:$true] %s202_s8 }
  0x3b   :  { %242 = vmatpush3.bf16.msra.mxu0 %v241_v5  ;;  %s336_s9 = scalar_lea.vmem %s203_s8, 128  ;;  %p341_p11 = scmp.lt.s32.totalorder %s203_s8, %s203_s8 }
  0x3c   :  { %243 = vmatprep.subr.bf16.mxu0 %v393_v0  ;;  %p337_p10 = scmp.ne.s32.totalorder %s203_s8, %s336_s9  ;;  %p342_p12 = scmp.lt.s32.totalorder %s336_s9, %s336_s9 }
  0x3e   :  { %p343_p13 = por %p342_p12, %p341_p11 }
  0x3f   :  { %245 = vmatpush3.bf16.msra.mxu0 %v244_v7 }
  0x40   :  { %246 = vmatprep.subr.bf16.mxu0 %v393_v0  ;;  %p344_p0 = pnand %p343_p13, %p337_p10 }
  0x43   :  { %248 = vmatpush3.bf16.msra.mxu0 %v247_v10 }
  0x46   :  { %238 = vmatmul.mubr.msk.f32.vlgmr.msra.gmra.mrb[0].mxu0 %vm72_vm1, %v58_v11 }
 0x119   :  { %v142_v13 = vpop.f32.mrb[0].mxu0 }
 0x11a   :  { %v143_v14 = vadd.f32 %v216_v12, %v142_v13  ;;  %v239_v15 = vpop.f32.mrb[1].mxu0 }
 0x11c   :  { %262 = vtanh.f32 %v143_v14  ;;  %v146_v18 = vsub.f32 0.0, %v143_v14 }
 0x11e   :  { %v147_v19 = vmul.f32 1.442695, %v146_v18 }
 0x120   :  { %264 = vpow2.f32 %v147_v19 }
 0x126   :  { %v263_v16 = vpop.eup %262 }
 0x127   :  { %160 = vrot.lane.b32.xlu0 %v263_v16, %s396_s30 }
 0x12a   :  { %v265_v20 = vpop.eup %264 }
 0x12b   :  { %155 = vrot.lane.b32.xlu0 %v153_v17, %s397_s6  ;;  %v149_v21 = vadd.f32 1.0, %v265_v20 }
 0x12d   :  { %266 = vrcp.f32 %v149_v21 }
 0x137   :  { %v267_v22 = vpop.eup %266 }
 0x199   :  { %v161_v23 = vpop.permute.xlu0 %160 }
 0x19a   :  { %v163_v24 = vmul.f32 %v267_v22, %v161_v23 }
 0x19c   :  { %165 = vrot.lane.b32.xlu1 %v163_v24, %s397_s6 }
 0x19d   :  { %v156_v25 = vpop.permute.xlu0 %155 }
 0x19e   :  { %v158_v26 = vmul.f32 %v267_v22, %v156_v25 }
 0x20e   :  { %v166_v27 = vpop.permute.xlu1 %165 }
 0x20f   :  { %v168_v28 = vadd.f32 %v166_v27, %v158_v26 }
 0x211   :  { %268 = vtanh.f32 %v168_v28  ;;  %176 = vrot.lane.b32.xlu0 %v168_v28, %s398_s3 }
 0x21b   :  { %v269_v29 = vpop.eup %268 }
 0x21c   :  { %171 = vrot.lane.b32.xlu1 %v269_v29, %s396_s30 }
 0x283   :  { %v177_v30 = vpop.permute.xlu0 %176 }
 0x284   :  { %180 = vst.msk [vmem:[#allocation9] sm:$0xff] %vm179_vm2, %v177_v30 }
 0x285   :  { %347 = shalt.err (!%p344_p0)
}
 0x286   :  { %s348_s12 = scalar_lea.hbm %s504_s5, 128 }
 0x287   :  { %p349_p1 = scmp.ne.s32.totalorder %s504_s5, %s348_s12  ;;  %p352_p2 = scmp.lt.u32.totalorder %s348_s12, %s504_s5 }
 0x289   :  { %p354_p3 = pnand %p352_p2, %p349_p1 }
 0x28b   :  { %357 = shalt.err (!%p354_p3)
}
 0x28c   :  { %205 = dma.vmem_to_hbm [thread:$0]  %s203_s8, 128, %s504_s5, [#allocation10]  }
 0x28d   :  { %s400_s18 = smov [#allocation8]  }
 0x28e   :  { %v172_v31 = vpop.permute.xlu1 %171  ;;  %s192_s19 = sshll.u32 %s400_s18, 4  ;;  %s193_s19 = int_to_ptr.vmem [resolvable:$true] %s192_s19 }
 0x28f   :  { %v174_v32 = vmul.f32 %v267_v22, %v172_v31  ;;  %s358_s20 = scalar_lea.vmem %s193_s19, 128  ;;  %p363_p5 = scmp.lt.s32.totalorder %s193_s19, %s193_s19 }
 0x290   :  { %p359_p4 = scmp.ne.s32.totalorder %s193_s19, %s358_s20  ;;  %p364_p6 = scmp.lt.s32.totalorder %s358_s20, %s358_s20 }
 0x291   :  { %182 = vrot.lane.b32.xlu1 %v174_v32, %s397_s6 }
 0x292   :  { %p365_p7 = por %p364_p6, %p363_p5 }
 0x294   :  { %p366_p8 = pnand %p365_p7, %p359_p4 }
 0x303   :  { %v183_v33 = vpop.permute.xlu1 %182 }
 0x304   :  { %185 = vst.msk [vmem:[#allocation8] sm:$0xff] %vm179_vm2, %v183_v33 }
 0x305   :  { %369 = shalt.err (!%p366_p8)
}
 0x306   :  { %s370_s5 = scalar_lea.hbm %s503_s4, 128 }
 0x307   :  { %p371_p9 = scmp.ne.s32.totalorder %s503_s4, %s370_s5  ;;  %p374_p10 = scmp.lt.u32.totalorder %s370_s5, %s503_s4 }
 0x309   :  { %p376_p11 = pnand %p374_p10, %p371_p9 }
 0x30b   :  { %379 = shalt.err (!%p376_p11)
}
 0x30c   :  { %195 = dma.vmem_to_hbm [thread:$0]  %s193_s19, 128, %s503_s4, [#allocation4]  }
 0x30d   :  { %384 = dma.done.wait [#allocation4], 128  }
 0x30e   :  { %385 = vsyncadd [#allocation4], 4294967168 }
 0x30f   :  { %386 = dma.done.wait [#allocation10], 128  }
 0x310   :  { %387 = vsyncadd [#allocation10], 4294967168 }
 0x311   :  { %212 = vsyncpa [#allocation3], 1 }
 0x312   :  { %213 = vsyncpa [#allocation6], 1 }
 0x313   :  { %214 = vsyncpa [#allocation4], 1 }
 0x314   :  { %215 = vsyncpa [#allocation10], 1 }

</bundles_post_ra>
